<compile_context>
chip_gen: v5e
topology: v5e:2x2
jax: 0.10.0
libtpu: 0.0.40
codegen_flags: <defaults>
</compile_context>

<pallas_src>
import jax
import jax.numpy as jnp
from jax.experimental import pallas as pl
from jax.experimental.pallas import tpu as pltpu


def _adaptive_loss_weight_kernel(w_ref, l_ref, o_ref):
    # w_ref, l_ref: (1, N) float32 VMEM tiles.  o_ref: (1, 1) float32 in SMEM.
    w = w_ref[...]            # (1, N)
    losses = l_ref[...]       # (1, N)

    # Numerically stable softplus(-w) = log(1 + exp(-w))
    #   = max(-w, 0) + log1p(exp(-|w|))
    softplus_neg_w = jnp.maximum(-w, 0.0) + jnp.log1p(jnp.exp(-jnp.abs(w)))

    o_ref[0, 0] = jnp.sum(w * losses + softplus_neg_w)


def adaptive_loss_weight(weights, losses):
    """weights, losses: 1-D float32 arrays of shape (num_losses,). Returns scalar."""
    n = weights.shape[0]
    w2d = weights.astype(jnp.float32).reshape(1, n)
    l2d = losses.astype(jnp.float32).reshape(1, n)

    out = pl.pallas_call(
        _adaptive_loss_weight_kernel,
        out_shape=jax.ShapeDtypeStruct((1, 1), jnp.float32),
        in_specs=[
            pl.BlockSpec(memory_space=pltpu.MemorySpace.VMEM),
            pl.BlockSpec(memory_space=pltpu.MemorySpace.VMEM),
        ],
        out_specs=pl.BlockSpec(memory_space=pltpu.MemorySpace.SMEM),
        cost_estimate=pl.CostEstimate(
            flops=5 * n,              # mul, mul, add, add, reduce-add per element
            transcendentals=2 * n,    # exp + log1p per element
            bytes_accessed=2 * 4 * n + 4,
        ),
    )(w2d, l2d)
    return out[0, 0]


if __name__ == "__main__":
    num_losses = 8

    # Deterministic parameter init, matching nn.Parameter(torch.ones(num_losses))
    weights = jnp.ones((num_losses,), dtype=jnp.float32)

    # Deterministic example "losses" input
    key = jax.random.PRNGKey(0)
    losses = jax.random.uniform(key, (num_losses,), dtype=jnp.float32)

    result = jax.block_until_ready(adaptive_loss_weight(weights, losses))

    # Reference check in plain JAX (module semantics)
    ref = jnp.sum(weights * losses + jnp.log(1.0 + jnp.exp(-weights)))
    assert jnp.allclose(result, ref, rtol=1e-5, atol=1e-5), (result, ref)

    # Second check with mixed-sign weights (exercises the stable softplus path)
    k1, k2 = jax.random.split(key)
    w_mixed = jax.random.uniform(
        k1, (num_losses,), minval=-3.0, maxval=3.0, dtype=jnp.float32
    )
    l_mixed = jax.random.uniform(k2, (num_losses,), dtype=jnp.float32)
    result2 = jax.block_until_ready(adaptive_loss_weight(w_mixed, l_mixed))
    ref2 = jnp.sum(w_mixed * l_mixed + jnp.log(1.0 + jnp.exp(-w_mixed)))
    assert jnp.allclose(result2, ref2, rtol=1e-5, atol=1e-5), (result2, ref2)

    print("KERNEL_OK")
</pallas_src>

<mosaic_0001>
module attributes {stable_mosaic.version = 11 : i64} {
  func.func @_adaptive_loss_weight_kernel(%arg0: memref<1x8xf32, #tpu.memory_space<vmem>>, %arg1: memref<1x8xf32, #tpu.memory_space<vmem>>, %arg2: memref<1x1xf32, #tpu.memory_space<smem>>) attributes {dimension_semantics = [], scalar_prefetch = 0 : i64, scratch_operands = 0 : i64, tpu.core_type = #tpu.core_type<tc>} {
    %c0 = arith.constant 0 : index
    %c0_0 = arith.constant 0 : index
    %0 = vector.load %arg0[%c0, %c0_0] : memref<1x8xf32, #tpu.memory_space<vmem>>, vector<1x8xf32>
    %c0_1 = arith.constant 0 : index
    %c0_2 = arith.constant 0 : index
    %1 = vector.load %arg1[%c0_1, %c0_2] : memref<1x8xf32, #tpu.memory_space<vmem>>, vector<1x8xf32>
    %cst = arith.constant 0.000000e+00 : f32
    %2 = vector.broadcast %cst : f32 to vector<1x8xf32>
    %3 = arith.subf %2, %0 : vector<1x8xf32>
    %cst_3 = arith.constant 0.000000e+00 : f32
    %4 = vector.broadcast %cst_3 : f32 to vector<1x8xf32>
    %5 = arith.maximumf %3, %4 : vector<1x8xf32>
    %6 = math.absf %0 : vector<1x8xf32>
    %cst_4 = arith.constant 0.000000e+00 : f32
    %7 = vector.broadcast %cst_4 : f32 to vector<1x8xf32>
    %8 = arith.subf %7, %6 : vector<1x8xf32>
    %9 = math.exp %8 : vector<1x8xf32>
    %10 = math.log1p %9 : vector<1x8xf32>
    %11 = arith.addf %5, %10 : vector<1x8xf32>
    %12 = arith.mulf %0, %1 : vector<1x8xf32>
    %13 = arith.addf %12, %11 : vector<1x8xf32>
    %14 = vector.shape_cast %13 : vector<1x8xf32> to vector<1x1x8xf32>
    %cst_5 = arith.constant dense<0.000000e+00> : vector<1xf32>
    %15 = vector.multi_reduction <add>, %14, %cst_5 [1, 2] : vector<1x1x8xf32> to vector<1xf32>
    %16 = vector.shape_cast %15 : vector<1xf32> to vector<1x1x1xf32>
    %17 = vector.extract %16[0, 0, 0] : f32 from vector<1x1x1xf32>
    %c0_6 = arith.constant 0 : index
    %c0_7 = arith.constant 0 : index
    %18 = memref.load %arg2[%c0_6, %c0_7] : memref<1x1xf32, #tpu.memory_space<smem>>
    memref.store %17, %arg2[%c0_6, %c0_7] : memref<1x1xf32, #tpu.memory_space<smem>>
    return
  }
}

</mosaic_0001>

<bundles_post_ra>
// kernel: tpu_custom_call.1
= control target key start
LH: loop header
LB: loop body
LE: loop exit
PB: predicated region body
PF: predicated region fallthrough
CT: control target
= control target key end

     0   :  { %7 = vsyncpa [#allocation3], 0  ;;  %s192_s0 = inlined_call_operand.hbm [shape: f32[1,8], index: 0, kind: input, shape index: {}]   ;;  %s193_s1 = inlined_call_operand.hbm [shape: f32[1,8], index: 1, kind: input, shape index: {}]   ;;  %s194_s2 = inlined_call_operand.hbm [shape: f32[1,1], index: 2, kind: output, shape index: {}]  }
   0x1   :  { %8 = vsyncpa [#allocation6], 0 }
   0x2   :  { %9 = vsyncpa [#allocation4], 0  ;;  %s15_s11 = sshll.u32 %s192_s0, 4  ;;  %s165_s12 = smov [#allocation2]   ;;  %s16_s11 = int_to_ptr.hbm [resolvable:$true] %s15_s11 }
   0x3   :  { %s17_s13 = sshll.u32 %s165_s12, 4  ;;  %s26_s16 = sshll.u32 %s193_s1, 4  ;;  %s18_s13 = int_to_ptr.vmem [resolvable:$true] %s17_s13  ;;  %s27_s16 = int_to_ptr.hbm [resolvable:$true] %s26_s16 }
   0x4   :  { %20 = dma.hbm_to_vmem [thread:$0]  %s16_s11, 16, %s18_s13, [#allocation3]  }
   0x5   :  { %s166_s17 = smov [#allocation5]  }
   0x6   :  { %s28_s18 = sshll.u32 %s166_s17, 4  ;;  %s29_s18 = int_to_ptr.vmem [resolvable:$true] %s28_s18 }
   0x7   :  { %31 = dma.hbm_to_vmem [thread:$0]  %s27_s16, 16, %s29_s18, [#allocation6]  }
   0x8   :  { %159 = dma.done.wait [#allocation3], 16  }
   0x9   :  { %160 = vsyncadd [#allocation3], 4294967280 }
   0xa   :  { %161 = dma.done.wait [#allocation6], 16  }
   0xb   :  { %162 = vsyncadd [#allocation6], 4294967280  ;;  %v40_v0 = vld [vmem:[#allocation2] sm:$0x1]  ;;  %v41_v10 = vld [vmem:[#allocation5] sm:$0x1] }
   0xc   :  { %v44_v1 = vand.u32 2147483647, %v40_v0  ;;  %v42_v8 = vsub.f32 0.0, %v40_v0  ;;  %v58_v15 = vmul.f32 %v41_v10, %v40_v0  ;;  %vm60_vm1 = vcmask 57344   ;;  %s78_s19 = sshll.u32 %s194_s2, 4  ;;  %s167_s21 = smov [#allocation7]   ;;  %s79_s19 = int_to_ptr.hbm [resolvable:$true] %s78_s19 }
   0xe   :  { %v45_v2 = vsub.f32 0.0, %v44_v1  ;;  %v43_v13 = vmax.f32 %v42_v8, 0.0 }
  0x10   :  { %v46_v3 = vmul.f32 1.442695, %v45_v2 }
  0x12   :  { %95 = vpow2.f32 %v46_v3 }
  0x18   :  { %v96_v4 = vpop.eup %95 }
  0x19   :  { %v48_v5 = vadd.f32 1.0, %v96_v4  ;;  %v51_v6 = vmul.f32 -0.5, %v96_v4  ;;  %v54_v9 = vand.u32 2147483647, %v96_v4 }
  0x1b   :  { %97 = vlog2.f32 %v48_v5  ;;  %v52_v7 = vadd.f32 1.0, %v51_v6  ;;  %vm55_vm0 = vcmp.lt.f32.partialorder %v54_v9, 0.0004427343 }
  0x1d   :  { %v53_v11 = vmul.f32 %v96_v4, %v52_v7 }
  0x21   :  { %v98_v12 = vpop.eup %97 }
  0x22   :  { %v50_v14 = vmul.f32 0.6931472, %v98_v12 }
  0x24   :  { %v56_v16 = vsel %vm55_vm0, %v53_v11, %v50_v14 }
  0x25   :  { %v57_v17 = vadd.f32 %v56_v16, %v43_v13 }
  0x27   :  { %v59_v18 = vadd.f32 %v58_v15, %v57_v17 }
  0x29   :  { %v61_v19 = vsel %vm60_vm1, %v59_v18, 0.0 }
  0x2a   :  { %62 = vadd.xlane.f32.xlu0 %v61_v19 }
  0x9d   :  { %v63_v20 = vpop.xlane.xlu0 %62 }
  0x9e   :  { %v64_v21 = vrot.slane %v63_v20, 4 }
  0xa0   :  { %v65_v22 = vadd.f32 %v64_v21, %v63_v20 }
  0xa2   :  { %v66_v23 = vrot.slane %v65_v22, 2 }
  0xa4   :  { %v67_v24 = vadd.f32 %v66_v23, %v65_v22 }
  0xa6   :  { %v68_v25 = vrot.slane %v67_v24, 1 }
  0xa8   :  { %v69_v26 = vadd.f32 %v68_v25, %v67_v24 }
  0xaa   :  { %90 = vpush %v69_v26 }
  0xdb   :  { %s91_s20 = spop %90 }
  0xdc   :  { %72 = sst [smem:[#allocation7]] %s91_s20 }
  0xdd   :  { %81 = dma.smem_to_hbm %s167_s21, 16, %s79_s19, [#allocation4]  }
  0xde   :  { %163 = dma.done.wait [#allocation4], 16  }
  0xdf   :  { %164 = vsyncadd [#allocation4], 4294967280 }
  0xe0   :  { %86 = sfence }
  0xe1   :  { %87 = vsyncpa [#allocation3], 1 }
  0xe2   :  { %88 = vsyncpa [#allocation6], 1 }
  0xe3   :  { %89 = vsyncpa [#allocation4], 1 }

</bundles_post_ra>
